<compile_context>
chip_gen: v6e
topology: v6e:2x2x1
jax: 0.10.0
libtpu: 0.0.40
codegen_flags: <defaults>
</compile_context>

<pallas_src>
import jax
import jax.numpy as jnp
from jax.experimental import pallas as pl
from jax.experimental.pallas import tpu as pltpu


def _prototypes_kernel(x_ref, wp_ref, bp_ref, wl_ref, bl_ref, o_ref):
    # x_ref:  (B, C, HW)     NCHW input with H*W flattened onto the lane axis
    # wp_ref: (C, Ncomp)     prototype weight, pre-transposed and pre-sliced
    # bp_ref: (1, Ncomp)     prototype bias (first n_components entries)
    # wl_ref: (Ncomp, OUT)   head weight, pre-transposed
    # bl_ref: (1, OUT)       head bias
    # o_ref:  (B, OUT)       logits for the whole batch (single store)
    x = x_ref[...].astype(jnp.float32)                 # (B, C, HW)
    pooled_x = jnp.mean(x, axis=-1)                    # (B, C)   lane-axis reduction
    emb = jnp.dot(pooled_x, wp_ref[...],
                  preferred_element_type=jnp.float32) + bp_ref[...]   # (B, Ncomp)
    logits = jnp.dot(emb, wl_ref[...],
                     preferred_element_type=jnp.float32) + bl_ref[...]  # (B, OUT)
    o_ref[...] = logits.astype(o_ref.dtype)


def prototypes_forward(x_nchw, wp, bp, wl, bl, *, n_components):
    """x_nchw: (b, c, h, w); wp: (P, c); bp: (P,); wl: (OUT, Ncomp); bl: (OUT,)."""
    b, c, h, w = x_nchw.shape
    out_features = wl.shape[0]
    hw = h * w

    # Glue (plain JAX, all cheap / layout-only):
    #   - NCHW -> (b, c, h*w) is a free reshape (no transpose).
    #   - Slice the prototype weight/bias to n_components instead of slicing activations.
    x_bc_hw = x_nchw.reshape(b, c, hw)                       # (B, C, HW)
    wp_t = jnp.transpose(wp[:n_components, :])               # (C, Ncomp)
    bp_2d = bp[:n_components].reshape(1, n_components)       # (1, Ncomp)
    wl_t = jnp.transpose(wl)                                 # (Ncomp, OUT)
    bl_2d = bl.reshape(1, out_features)                      # (1, OUT)

    vmem_spec = pl.BlockSpec(memory_space=pltpu.MemorySpace.VMEM)

    return pl.pallas_call(
        _prototypes_kernel,
        out_shape=jax.ShapeDtypeStruct((b, out_features), x_nchw.dtype),
        in_specs=[vmem_spec, vmem_spec, vmem_spec, vmem_spec, vmem_spec],
        out_specs=pl.BlockSpec(memory_space=pltpu.MemorySpace.VMEM),
    )(x_bc_hw, wp_t, bp_2d, wl_t, bl_2d)


def _reference_forward(x_nchw, wp, bp, wl, bl, *, n_components):
    # Mirrors the PyTorch module op-for-op (matmul over all pixels, then pool).
    b, c, h, w = x_nchw.shape
    pix = jnp.transpose(x_nchw, (0, 2, 3, 1)).reshape(b * h * w, c)
    emb = pix @ wp.T + bp                                # (b*h*w, P)
    emb = emb.reshape(b, h, w, -1)[..., :n_components]   # (b, h, w, Ncomp)
    pooled = emb.mean(axis=(1, 2))                       # (b, Ncomp)
    return pooled @ wl.T + bl                            # (b, OUT)


if __name__ == "__main__":
    # Module configuration (synthetic, deterministic).
    b, c, h, w = 2, 4, 16, 16       # input NCHW
    proto_out = 32                  # prototype_layer.out_features
    n_components = 32               # defaults to prototype_layer.out_features
    out_features = 1

    key = jax.random.PRNGKey(0)
    kx, kwp, kbp, kwl, kbl = jax.random.split(key, 5)

    x = jax.random.normal(kx, (b, c, h, w), dtype=jnp.float32)

    # nn.Linear-style uniform(-1/sqrt(fan_in), 1/sqrt(fan_in)) init, deterministic.
    bound_p = 1.0 / (c ** 0.5)
    wp = jax.random.uniform(kwp, (proto_out, c), jnp.float32, -bound_p, bound_p)
    bp = jax.random.uniform(kbp, (proto_out,), jnp.float32, -bound_p, bound_p)

    bound_l = 1.0 / (n_components ** 0.5)
    wl = jax.random.uniform(kwl, (out_features, n_components), jnp.float32,
                            -bound_l, bound_l)
    bl = jax.random.uniform(kbl, (out_features,), jnp.float32, -bound_l, bound_l)

    logits = prototypes_forward(x, wp, bp, wl, bl, n_components=n_components)
    logits = jax.block_until_ready(logits)

    ref = _reference_forward(x, wp, bp, wl, bl, n_components=n_components)
    assert logits.shape == (b, out_features)
    assert jnp.allclose(logits, ref, atol=1e-4, rtol=1e-4), (logits, ref)

    print("KERNEL_OK")
</pallas_src>

<mosaic_0001>
module attributes {stable_mosaic.version = 11 : i64} {
  func.func @_prototypes_kernel(%arg0: memref<2x4x256xf32, #tpu.memory_space<vmem>>, %arg1: memref<4x32xf32, #tpu.memory_space<vmem>>, %arg2: memref<1x32xf32, #tpu.memory_space<vmem>>, %arg3: memref<32x1xf32, #tpu.memory_space<vmem>>, %arg4: memref<1x1xf32, #tpu.memory_space<vmem>>, %arg5: memref<2x1xf32, #tpu.memory_space<vmem>>) attributes {dimension_semantics = [], scalar_prefetch = 0 : i64, scratch_operands = 0 : i64, tpu.core_type = #tpu.core_type<tc>} {
    %c0 = arith.constant 0 : index
    %c0_0 = arith.constant 0 : index
    %c0_1 = arith.constant 0 : index
    %0 = vector.load %arg0[%c0, %c0_0, %c0_1] : memref<2x4x256xf32, #tpu.memory_space<vmem>>, vector<2x4x256xf32>
    %cst = arith.constant dense<0.000000e+00> : vector<2x4xf32>
    %1 = vector.multi_reduction <add>, %0, %cst [2] : vector<2x4x256xf32> to vector<2x4xf32>
    %cst_2 = arith.constant 2.560000e+02 : f32
    %2 = vector.broadcast %cst_2 : f32 to vector<2x4xf32>
    %3 = arith.divf %1, %2 : vector<2x4xf32>
    %c0_3 = arith.constant 0 : index
    %c0_4 = arith.constant 0 : index
    %4 = vector.load %arg1[%c0_3, %c0_4] : memref<4x32xf32, #tpu.memory_space<vmem>>, vector<4x32xf32>
    %cst_5 = arith.constant dense<0.000000e+00> : vector<2x32xf32>
    %5 = tpu.matmul %3, %4, %cst_5 {dimension_numbers = #tpu.dot_dimension_numbers<[1], [0], [0], [1], [0, 0, 1, 1], [], []>} : vector<2x4xf32>, vector<4x32xf32>, vector<2x32xf32> -> vector<2x32xf32>
    %c0_6 = arith.constant 0 : index
    %c0_7 = arith.constant 0 : index
    %6 = vector.load %arg2[%c0_6, %c0_7] : memref<1x32xf32, #tpu.memory_space<vmem>>, vector<1x32xf32>
    %7 = vector.broadcast %6 : vector<1x32xf32> to vector<2x32xf32>
    %8 = arith.addf %5, %7 : vector<2x32xf32>
    %c0_8 = arith.constant 0 : index
    %c0_9 = arith.constant 0 : index
    %9 = vector.load %arg3[%c0_8, %c0_9] : memref<32x1xf32, #tpu.memory_space<vmem>>, vector<32x1xf32>
    %cst_10 = arith.constant dense<0.000000e+00> : vector<2x1xf32>
    %10 = tpu.matmul %8, %9, %cst_10 {dimension_numbers = #tpu.dot_dimension_numbers<[1], [0], [0], [1], [0, 0, 1, 1], [], []>} : vector<2x32xf32>, vector<32x1xf32>, vector<2x1xf32> -> vector<2x1xf32>
    %c0_11 = arith.constant 0 : index
    %c0_12 = arith.constant 0 : index
    %11 = vector.load %arg4[%c0_11, %c0_12] : memref<1x1xf32, #tpu.memory_space<vmem>>, vector<1x1xf32>
    %12 = vector.broadcast %11 : vector<1x1xf32> to vector<2x1xf32>
    %13 = arith.addf %10, %12 : vector<2x1xf32>
    %c0_13 = arith.constant 0 : index
    %c0_14 = arith.constant 0 : index
    %14 = vector.load %arg5[%c0_13, %c0_14] : memref<2x1xf32, #tpu.memory_space<vmem>>, vector<2x1xf32>
    tpu.vector_store %arg5[%c0_13, %c0_14], %13 {strides = array<i32>} : memref<2x1xf32, #tpu.memory_space<vmem>>, vector<2x1xf32>,
    return
  }
}

</mosaic_0001>

<bundles_post_ra>
// kernel: tpu_custom_call.1
= control target key start
LH: loop header
LB: loop body
LE: loop exit
PB: predicated region body
PF: predicated region fallthrough
CT: control target
= control target key end

     0   :  { %vm30_vm0 = vcmask 1043456   ;;  %v265_v10 = vmov 0.0   ;;  %vm266_vm1 = vmmov 0   ;;  %v54_v14 = vlaneseq  ;;  %s332_s0 = inlined_call_operand.vmem [shape: f32[2,4,256], index: 0, kind: input, shape index: {}]   ;;  %s333_s1 = inlined_call_operand.vmem [shape: f32[4,32], index: 1, kind: input, shape index: {}]   ;;  %s334_s3 = inlined_call_operand.vmem [shape: f32[32,1], index: 3, kind: input, shape index: {}]   ;;  %s335_s4 = inlined_call_operand.<no memory space> [shape: f32[1,1], index: 4, kind: input, shape index: {}]   ;;  %s336_s2 = inlined_call_operand.vmem [shape: f32[1,32], index: 2, kind: input, shape index: {}]   ;;  %s337_s5 = inlined_call_operand.vmem [shape: f32[2,1], index: 5, kind: output, shape index: {}]  }
   0x1   :  { %v22_v0 = vld [vmem:[%s332_s0] sm:$0xff]  ;;  %v23_v1 = vld [vmem:[%s332_s0 + $0x8] sm:$0xff]  ;;  %245 = vmatprep.subr.mxu0 %v265_v10  ;;  %247 = vmatprep.mubr.msk.f32.mxu0 %vm266_vm1, %v265_v10  ;;  %v145_v12 = vld [vmem:[%s334_s3 + $0x18] sm:$0xff]  ;;  %vm64_vm2 = vcmask 1041409   ;;  %vm66_vm3 = vcmask 31744   ;;  %v10_v27 = vstv %s335_s4  ;;  %vm153_vm4 = vcmask 261120  }
   0x2   :  { %v26_v2 = vcombine.high %v22_v0, %v22_v0  ;;  %v31_v3 = vsel %vm30_vm0, %v22_v0, 0.0  ;;  %v27_v4 = vcombine.high %v23_v1, %v23_v1  ;;  %v36_v6 = vsel %vm30_vm0, %v23_v1, 0.0  ;;  %v44_v11 = vld [vmem:[%s333_s1] sm:$0xf]  ;;  %250 = vmatprep.subr.mxu1 %v265_v10  ;;  %258 = vmatprep.mubr.msk.f32.mxu1 %vm266_vm1, %v265_v10  ;;  %v144_v13 = vld [vmem:[%s334_s3 + $0x10] sm:$0xff]  ;;  %v143_v25 = vld [vmem:[%s334_s3 + $0x8] sm:$0xff] }
   0x3   :  { %246 = vmatpush3.msk.msra.mxu0 %vm30_vm0, %v44_v11  ;;  %251 = vmatpush3.msra.mxu1 %v145_v12  ;;  %v55_v15 = vand.u32 127, %v54_v14  ;;  %v57_v16 = vshrl.u32 %v54_v14, 7  ;;  %v142_v26 = vld [vmem:[%s334_s3] sm:$0xff]  ;;  %11 = vst [vmem:[#allocation2] sm:$0x1] %v10_v27  ;;  %vm227_vm5 = vcmask 1024  }
   0x4   :  { %v32_v5 = vsel %vm30_vm0, %v26_v2, 0.0  ;;  %v37_v7 = vsel %vm30_vm0, %v27_v4, 0.0  ;;  %252 = vmatprep.subr.mxu1 %v265_v10  ;;  %v233_v28 = vld [vmem:[%s336_s2] ss:$0 sm:$0xff] }
   0x5   :  { %v33_v8 = vadd.f32 %v32_v5, %v31_v3  ;;  %v38_v9 = vadd.f32 %v37_v7, %v36_v6  ;;  %253 = vmatpush3.msra.mxu1 %v144_v13  ;;  %v58_v18 = vsub.s32 %v55_v15, %v57_v16 }
   0x6   :  { %254 = vmatprep.subr.mxu1 %v265_v10 }
   0x7   :  { %34 = vadd.xlane.f32.xlu0 %v33_v8  ;;  %255 = vmatpush3.msra.mxu1 %v143_v25 }
   0x8   :  { %256 = vmatprep.subr.mxu1 %v265_v10 }
   0x9   :  { %257 = vmatpush3.msra.mxu1 %v142_v26 }
   0xa   :  { %v236_v32 = vld [vmem:[#allocation2] ss:$0 sm:$0xff] }
   0xb   :  { %39 = vadd.xlane.f32.xlu0 %v38_v9 }
  0x90   :  { %v35_v17 = vpop.xlane.xlu0 %34 }
  0x91   :  { %v42_v19 = vmul.f32 0.00390625, %v35_v17 }
  0x93   :  { %v59_v22 = vrot.slane %v42_v19, %v58_v18 }
  0x94   :  { %v40_v20 = vpop.xlane.xlu0 %39 }
  0x95   :  { %v43_v21 = vmul.f32 0.00390625, %v40_v20 }
  0x97   :  { %v63_v23 = vrot.slane %v43_v21, %v58_v18 }
  0x99   :  { %v65_v24 = vsel %vm64_vm2, %v63_v23, %v59_v22 }
  0x9a   :  { %248 = vmatmul.mubr.msk.f32.vlgmr.msra.gmra.mxu0 %vm66_vm3, %v65_v24 }
 0x15a   :  { %v138_v29 = vpop.f32.mrf.mxu0 }
 0x15b   :  { %v139_v30 = vadd.f32 %v233_v28, %v138_v29 }
 0x15c   :  { %v249_v31 = vpop.f32.mrf.mxu0 }
 0x15d   :  { %259 = vmatmul.mubr.msk.f32.vlgmr.msra.gmra.mxu1 %vm153_vm4, %v139_v30 }
 0x21d   :  { %v223_v33 = vpop.f32.mrf.mxu1 }
 0x21e   :  { %v224_v34 = vadd.f32 %v236_v32, %v223_v33 }
 0x21f   :  { %v260_v35 = vpop.f32.mrf.mxu1 }
 0x220   :  { %228 = vst.msk [vmem:[%s337_s5] sm:$0x3] %vm227_vm5, %v224_v34 }

</bundles_post_ra>
